<compile_context>
chip_gen: v7x
topology: tpu7x:2x2x1
jax: 0.10.0
libtpu: 0.0.40
codegen_flags: <defaults>
</compile_context>

<pallas_src>
import functools

import jax
import jax.numpy as jnp
from jax import lax
from jax.experimental import pallas as pl
from jax.experimental.pallas import tpu as pltpu


def _cdiv(a, b):
    return -(-a // b)


def _round_up(x, m):
    return ((x + m - 1) // m) * m


def _vmem_capacity_bytes():
    """Per-core VMEM capacity; conservative fallback is v7x's 64 MiB/TC."""
    try:
        cap = getattr(pltpu.get_tpu_info(), "vmem_capacity_bytes", None)
        if cap:
            return int(cap)
    except Exception:  # interpret mode / API drift / non-TPU tracing
        pass
    return 64 << 20


def _mlp_kernel(x_ref, w_ref, b_ref, o_ref, acc_ref):
    # x_ref:   [tm, tk]  activations tile
    # w_ref:   [tn, tk]  PyTorch-layout weight tile (rows = output features)
    # b_ref:   [1,  tn]  bias row tile
    # o_ref:   [tm, tn]  output tile
    # acc_ref: [tm, tn]  f32 accumulator scratch (persists across the k axis)
    k = pl.program_id(2)

    # x @ W.T: contract the input-feature axis of both operands. This transposed
    # RHS is the same pattern the MXU consumes natively for q @ k.T; no
    # materialized weight transpose is performed per grid step.
    part = lax.dot_general(
        x_ref[...], w_ref[...],
        dimension_numbers=(((1,), (1,)), ((), ())),
        preferred_element_type=jnp.float32,
    )

    @pl.when(k == 0)
    def _():
        acc_ref[...] = part

    @pl.when(k != 0)
    def _():
        acc_ref[...] += part

    @pl.when(k == pl.num_programs(2) - 1)
    def _():
        y = acc_ref[...] + b_ref[...].astype(jnp.float32)
        o_ref[...] = jnp.tanh(y).astype(o_ref.dtype)


def _select_tiles(M, H, x_item, w_item, o_item, block_m, block_n, block_k, vmem_cap):
    budget = int(vmem_cap * 0.80)  # headroom for compiler internal scratch

    def lane_tile(h):
        # Largest lane-aligned column tile that divides H (keeps stores lane-dense
        # and avoids ragged j/k blocks); falls back to the full dim.
        return next((c for c in (512, 256, 128) if h % c == 0), h)

    # --- tn (output-feature tiling): bytes-based, dtype-aware residency test.
    resident_ok = (H * H * w_item) <= int(vmem_cap * 0.35)
    if block_n is not None and 0 < block_n < H and block_n % 128 == 0 and H % block_n == 0:
        tn = block_n
    elif block_n is not None and block_n >= H:
        tn = H
    elif resident_ok:
        tn = H
    else:
        tn = lane_tile(H)

    # --- tk (input-feature / reduction tiling): must divide H and be x128
    #     (ragged K would feed garbage into the reduction).
    if block_k is not None and 0 < block_k < H and block_k % 128 == 0 and H % block_k == 0:
        tk = block_k
    else:
        tk = H

    # --- tm (row tiling).
    tm = min(M, block_m)
    if tm < M:
        tm = _round_up(tm, 8)
    # Give v7x's two TensorCores work when M is small and there is no j split.
    if M > 8 and tm >= M and tn == H:
        tm = _round_up(_cdiv(M, 2), 8)

    def fits(tm_, tn_, tk_):
        w_bufs = 1 if (tn_ == H and tk_ == H) else 2
        b_bufs = 1 if tn_ == H else 2
        fp = (2 * tm_ * tk_ * x_item            # activations (double-buffered)
              + w_bufs * tn_ * tk_ * w_item     # weight tile(s)
              + 2 * tm_ * tn_ * o_item          # output tile (double-buffered)
              + b_bufs * tn_ * 4                # bias row
              + tm_ * tn_ * 4)                  # f32 accumulator scratch
        return fp <= budget

    # Fit the per-generation VMEM budget: shrink tm, then K-tile, then
    # column-tile the weight, then shrink tm further.
    while not fits(tm, tn, tk) and tm > 256:
        tm = max(256, _round_up(tm // 2, 8))
    if not fits(tm, tn, tk):
        for cand in (2048, 1024, 512, 256, 128):
            if cand < tk and H % cand == 0:
                tk = cand
                if fits(tm, tn, tk):
                    break
    if not fits(tm, tn, tk) and tn == H:
        tn = lane_tile(H)
    while not fits(tm, tn, tk) and tm > 64:
        tm = max(64, _round_up(tm // 2, 8))
    return tm, tn, tk


@functools.partial(
    jax.jit,
    static_argnames=("block_m", "block_n", "block_k", "compute_dtype", "out_dtype"))
def mlp_layer(features, weight, bias, *, block_m=1024, block_n=None, block_k=None,
              compute_dtype=None, out_dtype=None):
    """y = tanh(features @ weight.T + bias).

    features: [..., H]; weight: [H, H] PyTorch (out, in) layout; bias: [H].
    compute_dtype: optional matmul-input dtype (e.g. jnp.bfloat16). Pre-cast once
      at the call boundary (halves weight/activation DMA); accumulation is f32.
    out_dtype: optional output dtype (e.g. bf16 to halve the write stream).
    """
    orig_shape = features.shape
    H = orig_shape[-1]
    x = features.reshape(-1, H)
    M = x.shape[0]
    out_dt = jnp.dtype(out_dtype) if out_dtype is not None else features.dtype

    if compute_dtype is not None:
        cd = jnp.dtype(compute_dtype)
        if x.dtype != cd:
            x = x.astype(cd)
        if weight.dtype != cd:
            weight = weight.astype(cd)

    x_item = jnp.dtype(x.dtype).itemsize
    w_item = jnp.dtype(weight.dtype).itemsize
    o_item = jnp.dtype(out_dt).itemsize

    vmem_cap = _vmem_capacity_bytes()
    tm, tn, tk = _select_tiles(M, H, x_item, w_item, o_item,
                               block_m, block_n, block_k, vmem_cap)

    gi, gj, gk = _cdiv(M, tm), _cdiv(H, tn), _cdiv(H, tk)
    grid = (gi, gj, gk)

    b2d = bias.reshape(1, H)   # 2-D for TPU layout (cheap reshape)

    # Constant-index blocks only need a single VMEM buffer (no re-DMA across grid).
    if gj == 1 and gk == 1:
        w_spec = pl.BlockSpec((tn, tk), lambda i, j, k: (j, k),
                              pipeline_mode=pl.Buffered(1))
    else:
        w_spec = pl.BlockSpec((tn, tk), lambda i, j, k: (j, k))
    if gj == 1:
        b_spec = pl.BlockSpec((1, tn), lambda i, j, k: (0, j),
                              pipeline_mode=pl.Buffered(1))
    else:
        b_spec = pl.BlockSpec((1, tn), lambda i, j, k: (0, j))

    # Scoped-VMEM limit derived from the real footprint; never clamped below it
    # (tiles were already chosen so the footprint fits the generation budget).
    w_bufs = 1 if (gj == 1 and gk == 1) else 2
    b_bufs = 1 if gj == 1 else 2
    footprint = (2 * tm * tk * x_item + w_bufs * tn * tk * w_item
                 + 2 * tm * tn * o_item + b_bufs * tn * 4 + tm * tn * 4)
    vmem_limit = max(int(footprint * 1.25) + (2 << 20), 16 << 20)
    vmem_limit = min(vmem_limit, int(vmem_cap * 0.98))
    vmem_limit = max(vmem_limit, footprint)

    # Traffic model: weight re-streams once per row block when column/K-tiled;
    # activations re-stream once per column block.
    w_reads = 1 if (gj == 1 and gk == 1) else gi
    cost = pl.CostEstimate(
        flops=2 * M * H * H,
        transcendentals=M * H,
        bytes_accessed=int(gj * M * H * x_item + w_reads * H * H * w_item
                           + H * 4 + M * H * o_item),
    )

    out = pl.pallas_call(
        _mlp_kernel,
        out_shape=jax.ShapeDtypeStruct((M, H), out_dt),
        grid_spec=pltpu.PrefetchScalarGridSpec(
            num_scalar_prefetch=0,
            grid=grid,
            in_specs=[
                pl.BlockSpec((tm, tk), lambda i, j, k: (i, k)),   # activations
                w_spec,                                           # weight (PyTorch layout)
                b_spec,                                           # bias row
            ],
            out_specs=pl.BlockSpec((tm, tn), lambda i, j, k: (i, j)),
            scratch_shapes=[pltpu.VMEM((tm, tn), jnp.float32)],
        ),
        compiler_params=pltpu.CompilerParams(
            dimension_semantics=("parallel", "parallel", "arbitrary"),
            vmem_limit_bytes=int(vmem_limit),
        ),
        cost_estimate=cost,
    )(x, weight, b2d)

    return out.reshape(orig_shape)


def _reference(features, weight, bias):
    return jnp.tanh(features @ weight.T + bias)


if __name__ == "__main__":
    keys = jax.random.split(jax.random.PRNGKey(0), 9)

    # --- Spec-sized test: batch=2, seq=8, hidden=32 (row axis split across cores).
    B, S, H = 2, 8, 32
    bound = 1.0 / (H ** 0.5)
    features = jax.random.normal(keys[0], (B, S, H), dtype=jnp.float32)
    weight = jax.random.uniform(keys[1], (H, H), jnp.float32, -bound, bound)
    bias = jax.random.uniform(keys[2], (H,), jnp.float32, -bound, bound)

    out = jax.block_until_ready(mlp_layer(features, weight, bias))
    ref = _reference(features, weight, bias)
    assert out.shape == (B, S, H), out.shape
    assert jnp.allclose(out, ref, atol=1e-5, rtol=1e-5), (
        float(jnp.max(jnp.abs(out - ref))))

    # --- Ragged-M, resident-weight test (grid (3,1,1), masked final row block).
    M2, H2 = 296, 256
    bound2 = 1.0 / (H2 ** 0.5)
    x2 = jax.random.normal(keys[3], (M2, H2), dtype=jnp.float32)
    w2 = jax.random.uniform(keys[4], (H2, H2), jnp.float32, -bound2, bound2)
    b2 = jax.random.uniform(keys[5], (H2,), jnp.float32, -bound2, bound2)

    out2 = jax.block_until_ready(mlp_layer(x2, w2, b2, block_m=128))
    ref2 = _reference(x2, w2, b2)
    assert out2.shape == (M2, H2), out2.shape
    assert jnp.allclose(out2, ref2, atol=5e-5, rtol=5e-5), (
        float(jnp.max(jnp.abs(out2 - ref2))))

    # --- Full 3-D tiling path (row + column + K-reduction axes, f32 accumulator).
    M3, H3 = 256, 512
    bound3 = 1.0 / (H3 ** 0.5)
    x3 = jax.random.normal(keys[6], (M3, H3), dtype=jnp.float32)
    w3 = jax.random.uniform(keys[7], (H3, H3), jnp.float32, -bound3, bound3)
    b3 = jax.random.uniform(keys[8], (H3,), jnp.float32, -bound3, bound3)

    out3 = jax.block_until_ready(
        mlp_layer(x3, w3, b3, block_m=128, block_n=256, block_k=128))
    ref3 = _reference(x3, w3, b3)
    assert out3.shape == (M3, H3), out3.shape
    assert jnp.allclose(out3, ref3, atol=1e-4, rtol=1e-4), (
        float(jnp.max(jnp.abs(out3 - ref3))))

    print("KERNEL_OK")
</pallas_src>

<mosaic_0001>
module attributes {stable_mosaic.version = 11 : i64} {
  func.func @_mlp_kernel(%arg0: i32, %arg1: i32, %arg2: i32, %arg3: memref<8x32xf32, #tpu.memory_space<vmem>>, %arg4: memref<32x32xf32, #tpu.memory_space<vmem>>, %arg5: memref<1x32xf32, #tpu.memory_space<vmem>>, %arg6: memref<8x32xf32, #tpu.memory_space<vmem>>, %arg7: memref<8x32xf32, #tpu.memory_space<vmem>>) attributes {dimension_semantics = [#tpu.dimension_semantics<parallel>, #tpu.dimension_semantics<parallel>, #tpu.dimension_semantics<arbitrary>], iteration_bounds = array<i64: 2, 1, 1>, scalar_prefetch = 0 : i64, scratch_operands = 1 : i64, tpu.core_type = #tpu.core_type<tc>, window_params = [{transform_indices = @transform_0, window_bounds = array<i64: 8, 32>}, {pipeline_mode = #tpu.pipeline_mode<synchronous>, transform_indices = @transform_1, window_bounds = array<i64: 32, 32>}, {pipeline_mode = #tpu.pipeline_mode<synchronous>, transform_indices = @transform_2, window_bounds = array<i64: 1, 32>}, {transform_indices = @transform_3, window_bounds = array<i64: 8, 32>}]} {
    %c0 = arith.constant 0 : index
    %c0_0 = arith.constant 0 : index
    %0 = vector.load %arg3[%c0, %c0_0] : memref<8x32xf32, #tpu.memory_space<vmem>>, vector<8x32xf32>
    %c0_1 = arith.constant 0 : index
    %c0_2 = arith.constant 0 : index
    %1 = vector.load %arg4[%c0_1, %c0_2] : memref<32x32xf32, #tpu.memory_space<vmem>>, vector<32x32xf32>
    %cst = arith.constant dense<0.000000e+00> : vector<8x32xf32>
    %2 = tpu.matmul %0, %1, %cst {dimension_numbers = #tpu.dot_dimension_numbers<[1], [1], [0], [0], [0, 0, 1, 0], [], []>} : vector<8x32xf32>, vector<32x32xf32>, vector<8x32xf32> -> vector<8x32xf32>
    %c0_i32 = arith.constant 0 : i32
    %3 = arith.cmpi eq, %arg2, %c0_i32 : i32
    %4 = arith.extui %3 : i1 to i32
    %c0_i32_3 = arith.constant 0 : i32
    %5 = arith.cmpi ne, %4, %c0_i32_3 : i32
    scf.if %5 {
      %c0_8 = arith.constant 0 : index
      %c0_9 = arith.constant 0 : index
      %12 = vector.load %arg7[%c0_8, %c0_9] : memref<8x32xf32, #tpu.memory_space<vmem>>, vector<8x32xf32>
      tpu.vector_store %arg7[%c0_8, %c0_9], %2 {strides = array<i32>} : memref<8x32xf32, #tpu.memory_space<vmem>>, vector<8x32xf32>,
    } else {
    }
    %c0_i32_4 = arith.constant 0 : i32
    %6 = arith.cmpi ne, %arg2, %c0_i32_4 : i32
    %7 = arith.extui %6 : i1 to i32
    %c0_i32_5 = arith.constant 0 : i32
    %8 = arith.cmpi ne, %7, %c0_i32_5 : i32
    scf.if %8 {
      %c0_8 = arith.constant 0 : index
      %c0_9 = arith.constant 0 : index
      %12 = vector.load %arg7[%c0_8, %c0_9] : memref<8x32xf32, #tpu.memory_space<vmem>>, vector<8x32xf32>
      %13 = arith.addf %12, %2 : vector<8x32xf32>
      %c0_10 = arith.constant 0 : index
      %c0_11 = arith.constant 0 : index
      %14 = vector.load %arg7[%c0_10, %c0_11] : memref<8x32xf32, #tpu.memory_space<vmem>>, vector<8x32xf32>
      tpu.vector_store %arg7[%c0_10, %c0_11], %13 {strides = array<i32>} : memref<8x32xf32, #tpu.memory_space<vmem>>, vector<8x32xf32>,
    } else {
    }
    %c0_i32_6 = arith.constant 0 : i32
    %9 = arith.cmpi eq, %arg2, %c0_i32_6 : i32
    %10 = arith.extui %9 : i1 to i32
    %c0_i32_7 = arith.constant 0 : i32
    %11 = arith.cmpi ne, %10, %c0_i32_7 : i32
    scf.if %11 {
      %c0_8 = arith.constant 0 : index
      %c0_9 = arith.constant 0 : index
      %12 = vector.load %arg7[%c0_8, %c0_9] : memref<8x32xf32, #tpu.memory_space<vmem>>, vector<8x32xf32>
      %c0_10 = arith.constant 0 : index
      %c0_11 = arith.constant 0 : index
      %13 = vector.load %arg5[%c0_10, %c0_11] : memref<1x32xf32, #tpu.memory_space<vmem>>, vector<1x32xf32>
      %14 = vector.broadcast %13 : vector<1x32xf32> to vector<8x32xf32>
      %15 = arith.addf %12, %14 : vector<8x32xf32>
      %16 = math.tanh %15 : vector<8x32xf32>
      %c0_12 = arith.constant 0 : index
      %c0_13 = arith.constant 0 : index
      %17 = vector.load %arg6[%c0_12, %c0_13] : memref<8x32xf32, #tpu.memory_space<vmem>>, vector<8x32xf32>
      tpu.vector_store %arg6[%c0_12, %c0_13], %16 {strides = array<i32>} : memref<8x32xf32, #tpu.memory_space<vmem>>, vector<8x32xf32>,
    } else {
    }
    return
  }
  func.func @transform_0(%arg0: i32, %arg1: i32, %arg2: i32) -> (i32, i32) {
    %c0_i32 = arith.constant 0 : i32
    return %arg0, %arg2 : i32, i32
  }
  func.func @transform_1(%arg0: i32, %arg1: i32, %arg2: i32) -> (i32, i32) {
    %c0_i32 = arith.constant 0 : i32
    return %arg1, %arg2 : i32, i32
  }
  func.func @transform_2(%arg0: i32, %arg1: i32, %arg2: i32) -> (i32, i32) {
    %c0_i32 = arith.constant 0 : i32
    %c0_i32_0 = arith.constant 0 : i32
    return %c0_i32, %arg1 : i32, i32
  }
  func.func @transform_3(%arg0: i32, %arg1: i32, %arg2: i32) -> (i32, i32) {
    %c0_i32 = arith.constant 0 : i32
    return %arg0, %arg1 : i32, i32
  }
}

</mosaic_0001>

<bundles_post_ra>
// kernel: mlp_layer.1
= control target key start
LH: loop header
LB: loop body
LE: loop exit
PB: predicated region body
PF: predicated region fallthrough
CT: control target
= control target key end

     0   :  { %8 = vsyncpa [#allocation4], 0  ;;  %s1018_s0 = inlined_call_operand.hbm [shape: f32[16,32], index: 0, kind: input, shape index: {}]   ;;  %s1019_s1 = inlined_call_operand.hbm [shape: f32[32,32], index: 1, kind: input, shape index: {}]   ;;  %s1020_s2 = inlined_call_operand.vmem [shape: f32[1,32], index: 2, kind: input, shape index: {}]   ;;  %s1021_s3 = inlined_call_operand.hbm [shape: f32[16,32], index: 3, kind: output, shape index: {}]  }
   0x1   :  { %10 = vsyncpa [#allocation4 + $0x1], 0 }
   0x2   :  { %11 = vsyncpa [#allocation7], 0 }
   0x3   :  { %12 = vsyncpa [#allocation5], 0 }
   0x4   :  { %14 = vsyncpa [#allocation5 + $0x1], 0  ;;  %s792_s12 = smov 0   ;;  %s794_s13 = smov 0  }
   0x5   :  { %s796_s14 = smov 0   ;;  %s798_s15 = smov 0  }
   0x6   :  { %s800_s16 = smov 0   ;;  %s802_s17 = smov 0  }
   0x7 LB: > { %s492_s18 = sadd.s32 4294967295, %s762_s17   ;;  %s493_s19 = sadd.s32 4294967294, %s762_s17   ;;  %s762_s17 = sphi %s802_s17, %s20_s17   ;;  %s758_s16 = sphi %s800_s16, %s1045_s16   ;;  %s754_s15 = sphi %s798_s15, %s1044_s15   ;;  %s750_s14 = sphi %s796_s14, %s1043_s14   ;;  %s746_s13 = sphi %s794_s13, %s1042_s13   ;;  %s742_s12 = sphi %s792_s12, %s1041_s12  }
   0x8   : > { %p61_p0 = scmp.ne.s32.totalorder %s746_s13, %s742_s12  ;;  %p826_p1 = scmp.eq.s32.totalorder %s492_s18, 0 }
   0x9   : > { %p830_p2 = scmp.eq.s32.totalorder %s492_s18, 1  ;;  %p147_p3 = scmp.eq.s32.totalorder %s493_s19, 1 }
   0xa   : > { %s1026_s20 = scalar_select %p826_p1, 1, 0 }
   0xb   : > { %s1027_s21 = scalar_select %p830_p2, 1, 0 }
   0xc   : > { %p836_p4 = por %p826_p1, %p61_p0  ;;  %p494_p5 = scmp.ge.s32.totalorder %s762_s17, 1 }
   0xd   : > { %p841_p6 = por %p147_p3, %p61_p0  ;;  %p154_p7 = scmp.lt.s32.totalorder %s762_s17, 3 }
   0xe   : > { %s1028_s22 = scalar_select %p836_p4, 1, 0 }
   0xf   : > { %s1029_s23 = scalar_select %p841_p6, 1, 0 }
  0x10   : > { %p846_p8 = pnand %p494_p5, %p154_p7  ;;  %s764_s25 = smov [#allocation6]  }
  0x11   : > { %s170_s26 = sshll.u32 %s764_s25, 4  ;;  %s39_s28 = sadd.s32 1, %s758_s16  ;;  %s171_s26 = int_to_ptr.vmem [resolvable:$true] %s170_s26 }
  0x12   : > { %s1030_s24 = scalar_select %p846_p8, 1, 0 }
  0x13   : > { %p546_p9 = pneg %p846_p8  ;;  %s618_s4 = scalar_lea.hbm %s1019_s1, 512 }
  0x14   : > { %p619_p12 = scmp.ne.s32.totalorder %s1019_s1, %s618_s4  ;;  %p625_p5 = scmp.lt.u32.totalorder %s618_s4, %s1019_s1 }
  0x15   : > { %p855_p11 = pnand %p546_p9, %p826_p1 }
  0x17   : > { %p620_p13 = pneg %p855_p11 }
  0x19   : > { %p621_p0 = pnand %p620_p13, %p619_p12 }
  0x1b   : > { %p622_p3 = pneg %p621_p0 }
  0x1d   : > { %p627_p7 = pnand %p625_p5, %p622_p3 }
  0x1f   : > { %630 = shalt.err (!%p627_p7)
}
  0x20   : > { %s631_s9 = scalar_lea.vmem %s171_s26, 512  ;;  %p639_p1 = scmp.lt.s32.totalorder %s171_s26, %s171_s26 }
  0x21   : > { %p632_p9 = scmp.ne.s32.totalorder %s171_s26, %s631_s9  ;;  %p640_p4 = scmp.lt.s32.totalorder %s631_s9, %s631_s9 }
  0x23   : > { %p634_p10 = pnand %p632_p9, %p620_p13  ;;  %p641_p8 = por %p640_p4, %p639_p1 }
  0x25   : > { %p635_p6 = pneg %p634_p10 }
  0x27   : > { %p642_p2 = pnand %p641_p8, %p635_p6 }
  0x29   : > { %645 = shalt.err (!%p642_p2)
}
  0x2a   : > { %s765_s10 = smov 128   ;;  %s766_s11 = smov 8  }
  0x2b   : > { %549 = dma.hbm_to_vmem [thread:$0]  (!%p855_p11), %s1019_s1, 512, %s171_s26, [#allocation7], %s765_s10, %s765_s10, %s766_s11  }
  0x2c   : > { %p41_p1 = scmp.ge.s32.totalorder %s39_s28, 2  ;;  %s48_s25 = sadd.s32 1, %s750_s14 }
  0x2d   : > { %p55_p2 = scmp.ne.s32.totalorder %s750_s14, %s746_s13  ;;  %p56_p4 = scmp.eq.s32.totalorder %s762_s17, 0 }
  0x2e   : > { %s1047_s28 = smov (%p41_p1, %s39_s28), 0  ;;  %p1033_p8 = scmp.ne.s32.totalorder %s1027_s21, 0 }
  0x2f   : > { %p882_p6 = por %p56_p4, %p55_p2  ;;  %s43_s27 = ssub.s32 %s758_s16, %s1047_s28 }
  0x30   : > { %p888_p10 = por %p1033_p8, %p55_p2  ;;  %p559_p12 = scmp.lt.s32.totalorder %s762_s17, 2 }
  0x31   : > { %p46_p11 = scmp.eq.s32.totalorder %s43_s27, 0  ;;  %s190_s26 = sand.u32 1, %s750_s14  }
  0x32   : > { %s498_s4 = sshll.u32 %s190_s26, 3  ;;  %s499_s6 = sshll.u32 %s758_s16, 7 }
  0x33   : > { %s897_s5 = scalar_select %p46_p11, %s750_s14, %s48_s25  }
  0x34   : > { %s903_s9 = scalar_lea.hbm %s1018_s0, %s499_s6  ;;  %s194_s21 = scalar_lea.vmem [#allocation3], %s498_s4 }
  0x35   : > { %s202_s10 = sshll.u32 %s194_s21, 4  ;;  %p909_p13 = pnand %p559_p12, %p882_p6  ;;  %s905_s10 = int_to_ptr.vmem [resolvable:$true] %s202_s10 }
  0x36   : > { %s191_s18 = scalar_lea.sflag [#allocation4], %s190_s26  ;;  %s646_s19 = scalar_lea.hbm %s903_s9, 128 }
  0x37   : > { %p647_p0 = scmp.ne.s32.totalorder %s903_s9, %s646_s19  ;;  %p648_p3 = pneg %p909_p13 }
  0x38   : > { %s651_s4 = scalar_lea.hbm %s1018_s0, 256  ;;  %p652_p9 = scmp.lt.u32.totalorder %s903_s9, %s1018_s0 }
  0x39   : > { %p649_p5 = pnand %p648_p3, %p647_p0  ;;  %p653_p1 = scmp.lt.u32.totalorder %s651_s4, %s646_s19 }
  0x3a   : > { %p655_p4 = scmp.lt.u32.totalorder %s646_s19, %s903_s9 }
  0x3b   : > { %p650_p7 = pneg %p649_p5  ;;  %p654_p2 = por %p653_p1, %p652_p9 }
  0x3d   : > { %p656_p6 = por %p655_p4, %p654_p2 }
  0x3f   : > { %p657_p8 = pnand %p656_p6, %p650_p7 }
  0x41   : > { %660 = shalt.err (!%p657_p8)
}
  0x42   : > { %s661_s26 = scalar_lea.vmem %s905_s10, 128  ;;  %s767_s7 = smov [#allocation3]  }
  0x43   : > { %p662_p12 = scmp.ne.s32.totalorder %s905_s10, %s661_s26  ;;  %s666_s8 = sshll.u32 %s767_s7, 4  ;;  %s667_s8 = int_to_ptr.vmem [resolvable:$false] %s666_s8 }
  0x44   : > { %s668_s21 = scalar_lea.vmem %s667_s8, 256  ;;  %p669_p5 = scmp.lt.s32.totalorder %s905_s10, %s667_s8 }
  0x45   : > { %p664_p11 = pnand %p662_p12, %p648_p3  ;;  %p670_p9 = scmp.lt.s32.totalorder %s668_s21, %s661_s26 }
  0x47   : > { %p665_p0 = pneg %p664_p11  ;;  %p671_p1 = por %p670_p9, %p669_p5 }
  0x49   : > { %p672_p2 = pnand %p671_p1, %p665_p0 }
  0x4b   : > { %675 = shalt.err (!%p672_p2)
}
  0x4c   : > { %553 = dma.hbm_to_vmem [thread:$0]  (!%p909_p13), %s903_s9, 128, %s905_s10, %s191_s18  }
  0x4d   : > { %p1036_p7 = scmp.ne.s32.totalorder %s1030_s24, 0 }
  0x4e   : > { %s941_s19 = sand.u32 (!%p1036_p7), 1, %s746_s13   ;;  %p1037_p3 = scmp.ne.s32.totalorder (!%p1036_p7), %s1028_s22, 0 }
  0x4f   : > { %211 = sbr.rel (%p1036_p7) target bundleno = 356 (0x164), region = 32  ;;  %s501_s25 = sshll.u32 (!%p1036_p7), %s941_s19, 3 }
  0x50   : > { %s214_s27 = scalar_lea.sflag (!%p1036_p7), [#allocation4], %s941_s19  ;;  %s217_s4 = scalar_lea.vmem (!%p1036_p7), [#allocation3], %s501_s25 }
  0x56   : > { %729 = dma.done.wait (%p1037_p3), %s214_s27, 128  }
  0x57   : > { %731 = vsyncadd (%p1037_p3), %s214_s27, 4294967168  ;;  %p1038_p13 = scmp.ne.s32.totalorder %s1026_s20, 0 }
  0x59   : > { %733 = dma.done.wait (%p1038_p13), [#allocation7], 512  }
  0x5a   : > { %735 = vsyncadd (%p1038_p13), [#allocation7], 4294966784  ;;  %v768_v0 = vmov 0.0|0.0   ;;  %vm769_vm0 = vmmov 0   ;;  %v770_v1 = vmov 0.0   ;;  %vm256_vm1 = vcmask 261120  }
  0x5b   : > { %530 = vmatprep.subr.bf16.mxu0 %v768_v0  ;;  %527 = vmatprep.mubr.msk.f32.mxu0 %vm769_vm0, %v770_v1  ;;  %v252_v2 = vld [vmem:[#allocation6] sm:$0xff]  ;;  %v253_v3 = vld [vmem:[#allocation6 + $0x8] sm:$0xff]  ;;  %vm532_vm2 = vmpackc.low %vm256_vm1, %vm256_vm1  ;;  %s511_s24 = sshll.u32 %s754_s15, 7  ;;  %s246_s9 = scalar_lea.vmem [#allocation8], %s501_s25 }
  0x5c   : > { %v531_v4 = vpack.c.bf16 %v253_v3, %v252_v2  ;;  %v254_v5 = vld [vmem:[#allocation6 + $0x10] sm:$0xff]  ;;  %v255_v6 = vld [vmem:[#allocation6 + $0x18] sm:$0xff]  ;;  %v509_v11 = vld [vmem:[%s1020_s2] ss:$0 sm:$0xff]  ;;  %s383_s10 = sshll.u32 %s246_s9, 4  ;;  %s968_s29 = scalar_lea.hbm %s1021_s3, %s511_s24  ;;  %s970_s10 = int_to_ptr.vmem [resolvable:$true] %s383_s10 }
  0x5d   : > { %v535_v7 = vpack.c.bf16 %v255_v6, %v254_v5  ;;  %v251_v8 = vld [vmem:[%s217_s4] sm:$0xff]  ;;  %s369_s6 = scalar_lea.sflag [#allocation5], %s941_s19  ;;  %s676_s26 = scalar_lea.vmem %s970_s10, 128 }
  0x5e   : > { %533 = vmatpush3.bf16.xpose.msk.msra.mxu0 %vm532_vm2, %v531_v4  ;;  %p677_p4 = scmp.ne.s32.totalorder %s970_s10, %s676_s26  ;;  %s771_s15 = smov [#allocation8]  }
  0x5f   : > { %534 = vmatprep.subr.bf16.mxu0 %v768_v0  ;;  %s680_s7 = sshll.u32 %s771_s15, 4  ;;  %s681_s7 = int_to_ptr.vmem [resolvable:$false] %s680_s7 }
  0x60   : > { %p678_p6 = pnand %p677_p4, %p888_p10  ;;  %s682_s8 = scalar_lea.vmem %s681_s7, 256 }
  0x61   : > { %p683_p12 = scmp.lt.s32.totalorder %s970_s10, %s681_s7  ;;  %p684_p11 = scmp.lt.s32.totalorder %s682_s8, %s676_s26 }
  0x62   : > { %p679_p8 = pneg %p678_p6 }
  0x63   : > { %p685_p0 = por %p684_p11, %p683_p12 }
  0x65   : > { %p686_p5 = pnand %p685_p0, %p679_p8 }
  0x66   : > { %537 = vmatpush3.bf16.xpose.msk.msra.mxu0 %vm532_vm2, %v535_v7 }
  0x6d   : > { %528 = vmatmul.mubr.msk.f32.vlgmr.msra.gmra.mrb[0].mxu0 %vm256_vm1, %v251_v8 }
 0x140   : > { %v338_v9 = vpop.f32.mrb[0].mxu0 }
 0x141   : > { %346 = vst.msk [vmem:[#allocation2] sm:$0xff] %vm256_vm1, %v338_v9  ;;  %v529_v10 = vpop.f32.mrb[1].mxu0 }
 0x148   : > { %v357_v12 = vld [vmem:[#allocation2] sm:$0xff] }
 0x149   : > { %v365_v13 = vadd.f32 %v509_v11, %v357_v12 }
 0x14b   : > { %616 = vtanh.f32 %v365_v13 }
 0x155   : > { %v617_v14 = vpop.eup %616 }
 0x156   : > { %367 = vst.msk [vmem:[%s246_s9] sm:$0xff] %vm256_vm1, %v617_v14 }
 0x157   : > { %689 = shalt.err (!%p686_p5)
}
 0x158   : > { %s690_s21 = scalar_lea.hbm %s968_s29, 128  ;;  %s694_s27 = scalar_lea.hbm %s1021_s3, 256 }
 0x159   : > { %p691_p9 = scmp.ne.s32.totalorder %s968_s29, %s690_s21  ;;  %p695_p7 = scmp.lt.u32.totalorder %s968_s29, %s1021_s3 }
 0x15a   : > { %p696_p3 = scmp.lt.u32.totalorder %s694_s27, %s690_s21  ;;  %p698_p4 = scmp.lt.u32.totalorder %s690_s21, %s968_s29 }
 0x15b   : > { %p692_p1 = pnand %p691_p9, %p888_p10 }
 0x15c   : > { %p697_p13 = por %p696_p3, %p695_p7 }
 0x15d   : > { %p693_p2 = pneg %p692_p1 }
 0x15e   : > { %p699_p6 = por %p698_p4, %p697_p13 }
 0x160   : > { %p700_p8 = pnand %p699_p6, %p693_p2 }
 0x162   : > { %703 = shalt.err (!%p700_p8)
}
 0x163   : > { %544 = dma.vmem_to_hbm [thread:$0]  (%p888_p10), %s970_s10, 128, %s968_s29, %s369_s6  }
 0x164 PF: > { %s395_s22 = sand.u32 1, %s742_s12   ;;  %p1039_p12 = scmp.ne.s32.totalorder %s1029_s23, 0 }
 0x165   : > { %p1040_p11 = scmp.ge.s32.totalorder %s762_s17, 2  ;;  %s396_s24 = scalar_lea.sflag [#allocation5], %s395_s22 }
 0x167   : > { %p555_p0 = pnand %p1040_p11, %p1039_p12 }
 0x169   : > { %737 = dma.done.wait (!%p555_p0), %s396_s24, 128  }
 0x16a   : > { %739 = vsyncadd (!%p555_p0), %s396_s24, 4294967168  ;;  %s20_s17 = sadd.s32 1, %s762_s17   ;;  %s1041_s12 = smov %s746_s13 }
 0x16b   : > { %p17_p5 = scmp.ge.s32.totalorder %s20_s17, 4   ;;  %s1042_s13 = smov %s750_s14 }
 0x16c   : > { %s1043_s14 = smov %s897_s5  ;;  %s1044_s15 = smov %s758_s16 }
 0x16d   : > { %s1045_s16 = smov %s1047_s28  ;;  %19 = sbr.rel (!%p17_p5) target bundleno = 7 (0x7), region = 97 }
 0x174   :  { %401 = vsyncpa [#allocation4], 1 }
 0x175   :  { %403 = vsyncpa [#allocation4 + $0x1], 1 }
 0x176   :  { %404 = vsyncpa [#allocation7], 1 }
 0x177   :  { %405 = vsyncpa [#allocation5], 1 }
 0x178   :  { %407 = vsyncpa [#allocation5 + $0x1], 1 }

</bundles_post_ra>
